<compile_context>
chip_gen: v6e
topology: v6e:2x2x1
jax: 0.10.0
libtpu: 0.0.40
codegen_flags: <defaults>
</compile_context>

<pallas_src>
import functools

import jax
import jax.numpy as jnp
from jax import lax
from jax.experimental import pallas as pl
from jax.experimental.pallas import tpu as pltpu


def _round_up(x, m):
    return (x + m - 1) // m * m


def _largest_divisor_leq(n, cap):
    cap = max(1, min(n, cap))
    for d in range(cap, 0, -1):
        if n % d == 0:
            return d
    return 1


def _vmem_limit_bytes():
    # v7x: 64 MiB VMEM per TensorCore -> ~48 MiB budget; v5e/v6e: 128 MiB -> ~96 MiB.
    try:
        cap = getattr(pltpu.get_tpu_info(), "vmem_capacity_bytes", 0)
    except Exception:
        cap = 0
    if cap:
        return int(min(cap * 3 // 4, 96 * 1024 * 1024))
    return 48 * 1024 * 1024


def dense_basic_block_kernel(x_ref, halo_ref, scale_ref, shift_ref, w_ref, o_ref, *,
                             Bt, C, G, K, pad, TILE_L, L_valid, L_total, use_roll):
    # x_ref:     (Bt, C, TILE_L)            input tile
    # halo_ref:  (Bt, 1, C, 2*max(pad,1))   pre-activated, zero-masked 'same'-padding halo columns
    # scale_ref: (C, 1) f32                 folded BN scale = gamma / sqrt(var + eps)
    # shift_ref: (C, 1) f32                 folded BN shift = beta - mean * scale
    # w_ref:     (K, G, C) bf16             conv weight, tap-major
    # o_ref:     (Bt, C+G, TILE_L)          output = concat([x, new_features], channel)
    compute_dtype = w_ref.dtype

    # DenseNet passthrough as one bulk store (x dtype == out dtype), overlapped with the
    # MXU work below by the scheduler.
    o_ref[:, :C, :] = x_ref[...]

    scale = scale_ref[...]                                  # (C, 1) f32
    shift = shift_ref[...]                                  # (C, 1) f32
    w_taps = [w_ref[k] for k in range(K)]                   # K small (G, C) bf16 tiles

    lane = lax.broadcasted_iota(jnp.int32, (1, TILE_L), 1)  # lane index within the tile
    mask_tail = L_valid < L_total                           # only when L was padded to 128-mult
    if mask_tail:
        in_range = (lane + pl.program_id(1) * TILE_L) < L_valid

    def body(b, carry):
        x_b = x_ref[b]                                      # (C, TILE_L)

        # BatchNorm (eval, folded) + ReLU in f32 (safe on v5e's VPU; only ~2 vregs per b).
        act = jnp.maximum(x_b.astype(jnp.float32) * scale + shift, 0.0)
        if mask_tail:
            act = jnp.where(in_range, act, 0.0)             # padded L tail -> zero activation

        if pad > 0:
            h = halo_ref[b][0]                              # (C, 2*pad) bf16 halo columns

        if use_roll:
            # operand_k[:, j] = act_padded[:, j + k]; the circular roll is correct everywhere
            # except the first (pad-k) / last (k-pad) lanes, which are patched from the halo.
            # Rolls ride the XLU slot; rolling the f32 value keeps the plainest 32-bit layout.
            acc = jnp.dot(w_taps[pad], act.astype(compute_dtype),
                          preferred_element_type=jnp.float32)
            for k in range(K):
                if k == pad:
                    continue
                opd = pltpu.roll(act, shift=(pad - k) % TILE_L, axis=1).astype(compute_dtype)
                if k < pad:
                    for i in range(pad - k):                # leading lanes <- left halo
                        opd = jnp.where(lane == i, h[:, k + i:k + i + 1], opd)
                else:
                    for i in range(k - pad):                # trailing lanes <- right halo
                        opd = jnp.where(lane == TILE_L + pad - k + i,
                                        h[:, pad + i:pad + i + 1], opd)
                acc = acc + jnp.dot(w_taps[k], opd, preferred_element_type=jnp.float32)
        else:
            # Small / non-lane-aligned single-tile fallback: build the padded activation in
            # registers (concat + static slices); TILE_L is tiny here so cost is negligible.
            act_c = act.astype(compute_dtype)
            if pad > 0:
                act_p = jnp.concatenate([h[:, :pad], act_c, h[:, pad:2 * pad]], axis=-1)
            else:
                act_p = act_c
            acc = jnp.dot(w_taps[0], act_p[:, 0:TILE_L], preferred_element_type=jnp.float32)
            for k in range(1, K):
                acc = acc + jnp.dot(w_taps[k], act_p[:, k:k + TILE_L],
                                    preferred_element_type=jnp.float32)

        o_ref[pl.ds(b, 1), pl.ds(C, G), :] = acc[None].astype(o_ref.dtype)
        return carry

    # fori_loop (not a static Python unroll) keeps vreg live ranges bounded per batch element.
    lax.fori_loop(0, Bt, body, 0, unroll=bool(Bt <= 8))


def dense_basic_block(x, conv_w, bn_gamma, bn_beta, bn_mean, bn_var, eps=1e-5):
    """x: (B, C, L); conv_w: (G, C, K); BN params: (C,). Returns (B, C+G, L)."""
    B, C, L = x.shape
    G, Cw, K = conv_w.shape
    if Cw != C:
        raise ValueError(f"conv_w in_channels {Cw} != x channels {C}")
    if K % 2 != 1:
        raise ValueError("filter_length must be odd to reproduce torch-style 'same' padding")
    pad = (K - 1) // 2
    pad_h = max(pad, 1)
    compute_dtype = jnp.bfloat16
    itemsize = x.dtype.itemsize
    vmem_limit = _vmem_limit_bytes()

    # ---- L handling: avoid wrapper-side pad/slice HBM copies whenever possible ----
    per_col_bytes = (2 * C + G) * itemsize                 # x-in + out bytes per (b, column)
    if L % 128 == 0:
        L_eff, tiled_l, use_roll = L, True, True           # lane-dense tiles, no padding
    elif L <= 1024 and 2 * L * per_col_bytes <= vmem_limit // 2:
        L_eff, tiled_l, use_roll = L, False, False         # single full-L block, no padding
    else:
        L_eff, tiled_l, use_roll = _round_up(L, 128), True, True   # rare padded fallback

    if tiled_l:
        TILE_L = 128
        for cand in range(2048, 127, -128):                # largest 128-multiple divisor <= 2048
            if L_eff % cand == 0:
                TILE_L = cand
                break
        while TILE_L % 256 == 0 and 2 * TILE_L * per_col_bytes > vmem_limit // 2:
            TILE_L //= 2                                   # keep even Bt=1 steps inside VMEM
    else:
        TILE_L = L_eff

    # ---- batch block: target ~1.5 MiB of HBM traffic per grid step; never pad B ----
    per_elem_step_bytes = TILE_L * per_col_bytes
    Bt_cap = max(1, min(32, (3 * 512 * 1024) // per_elem_step_bytes))
    while Bt_cap > 1 and 2 * Bt_cap * per_elem_step_bytes > vmem_limit // 2:
        Bt_cap //= 2                                       # double-buffered in+out must fit
    Bt = _largest_divisor_leq(B, Bt_cap)

    # ---- guarantee >= 2 parallel grid steps (v7x: 2 TensorCores); aim for 4 while the
    #      per-step payload stays >= ~1 MiB ----
    def n_steps(bt, tl):
        return (B // bt) * (L_eff // tl)

    while n_steps(Bt, TILE_L) < 4:
        must_split = n_steps(Bt, TILE_L) < 2
        if not must_split and Bt * TILE_L * per_col_bytes < 1024 * 1024:
            break
        if Bt > 1:
            Bt = _largest_divisor_leq(B, Bt // 2)
        elif tiled_l and TILE_L % 256 == 0:
            TILE_L //= 2
        else:
            break
    num_l = L_eff // TILE_L

    # ---- fold eval-mode BN into per-channel scale/shift (f32) ----
    gamma = bn_gamma.astype(jnp.float32)
    inv_std = lax.rsqrt(bn_var.astype(jnp.float32) + eps)
    scale = (gamma * inv_std).reshape(C, 1)
    shift = (bn_beta.astype(jnp.float32)
             - bn_mean.astype(jnp.float32) * gamma * inv_std).reshape(C, 1)
    w_kgc = jnp.transpose(conv_w, (2, 0, 1)).astype(compute_dtype)   # (K, G, C), tap-major

    # ---- tiny per-tile 'same'-padding halo: pre-activated and zero-masked at sequence ends ----
    if pad > 0:
        base = jnp.arange(num_l, dtype=jnp.int32) * TILE_L
        offs = jnp.concatenate([jnp.arange(-pad, 0, dtype=jnp.int32),
                                jnp.arange(TILE_L, TILE_L + pad, dtype=jnp.int32)])
        cols = base[:, None] + offs[None, :]                          # (num_l, 2*pad)
        valid = (cols >= 0) & (cols < L)
        gidx = jnp.clip(cols, 0, L - 1).reshape(-1)
        xh = x[:, :, gidx].reshape(B, C, num_l, 2 * pad)
        ah = jnp.maximum(xh.astype(jnp.float32) * scale.reshape(1, C, 1, 1)
                         + shift.reshape(1, C, 1, 1), 0.0)
        ah = jnp.where(valid[None, None], ah, 0.0)                    # zero 'same' padding
        halo = jnp.transpose(ah, (0, 2, 1, 3)).astype(compute_dtype)  # (B, num_l, C, 2*pad)
    else:
        halo = jnp.zeros((B, num_l, C, 2 * pad_h), compute_dtype)

    x_in = x if L_eff == L else jnp.pad(x, ((0, 0), (0, 0), (0, L_eff - L)))

    kernel = functools.partial(
        dense_basic_block_kernel,
        Bt=Bt, C=C, G=G, K=K, pad=pad, TILE_L=TILE_L,
        L_valid=L, L_total=L_eff, use_roll=use_roll)

    out = pl.pallas_call(
        kernel,
        out_shape=jax.ShapeDtypeStruct((B, C + G, L_eff), x.dtype),
        grid_spec=pltpu.PrefetchScalarGridSpec(
            num_scalar_prefetch=0,
            grid=(B // Bt, num_l),
            in_specs=[
                pl.BlockSpec((Bt, C, TILE_L), lambda b, l: (b, 0, l)),           # x tile
                pl.BlockSpec((Bt, 1, C, 2 * pad_h), lambda b, l: (b, l, 0, 0)),  # halo (tiny)
                pl.BlockSpec((C, 1), lambda b, l: (0, 0)),                       # BN scale
                pl.BlockSpec((C, 1), lambda b, l: (0, 0)),                       # BN shift
                pl.BlockSpec((K, G, C), lambda b, l: (0, 0, 0)),                 # conv weight
            ],
            out_specs=pl.BlockSpec((Bt, C + G, TILE_L), lambda b, l: (b, 0, l)),
        ),
        compiler_params=pltpu.CompilerParams(
            dimension_semantics=("parallel", "parallel"),
            vmem_limit_bytes=int(vmem_limit),
        ),
    )(x_in, halo, scale, shift, w_kgc)

    return out if L_eff == L else out[:, :, :L]


def reference(x, conv_w, gamma, beta, mean, var, eps=1e-5):
    """Pure-JAX f32 reference of the same forward pass."""
    xn = (x - mean[None, :, None]) / jnp.sqrt(var[None, :, None] + eps)
    act = jnp.maximum(xn * gamma[None, :, None] + beta[None, :, None], 0.0)
    pad = (conv_w.shape[-1] - 1) // 2
    new = jax.lax.conv_general_dilated(
        act, conv_w, window_strides=(1,), padding=[(pad, pad)],
        dimension_numbers=("NCH", "OIH", "NCH"))
    return jnp.concatenate([x, new], axis=1)


if __name__ == "__main__":
    key = jax.random.PRNGKey(0)

    def run_case(case_id, B, C, L, G, K):
        k1, k2, k3, k4, k5, k6 = jax.random.split(jax.random.fold_in(key, case_id), 6)
        x      = jax.random.normal(k1, (B, C, L), jnp.float32)
        conv_w = jax.random.normal(k2, (G, C, K), jnp.float32) * 0.1   # Conv1d weight (bias=False)
        gamma  = jax.random.uniform(k3, (C,), jnp.float32, 0.5, 1.5)   # BN weight
        beta   = jax.random.normal(k4, (C,), jnp.float32) * 0.1        # BN bias
        mean   = jax.random.normal(k5, (C,), jnp.float32) * 0.1        # BN running_mean
        var    = jax.random.uniform(k6, (C,), jnp.float32, 0.5, 1.5)   # BN running_var

        out = jax.block_until_ready(dense_basic_block(x, conv_w, gamma, beta, mean, var))
        ref = reference(x, conv_w, gamma, beta, mean, var)

        assert out.shape == (B, C + G, L), out.shape
        # DenseNet passthrough channels must be exact.
        assert jnp.allclose(out[:, :C], x, atol=1e-6), \
            float(jnp.max(jnp.abs(out[:, :C] - x)))
        # New features use bf16 MXU operands -> compare against the f32 reference loosely.
        err = float(jnp.max(jnp.abs(out[:, C:] - ref[:, C:])))
        assert jnp.allclose(out[:, C:], ref[:, C:], atol=5e-2, rtol=5e-2), err

    # Small module-docstring shape: exercises the full-L (no-pad, concat) path.
    run_case(0, B=2, C=4, L=16, G=8, K=3)
    # Lane-aligned shape: exercises the lane-dense tiled roll path, cross-tile halos, pad=2,
    # and the >=2-parallel-steps grid adjustment (B=1 -> L is split).
    run_case(1, B=1, C=6, L=512, G=10, K=5)

    print("KERNEL_OK")
</pallas_src>

<mosaic_0001>
module attributes {stable_mosaic.version = 11 : i64} {
  func.func @dense_basic_block_kernel(%arg0: i32, %arg1: i32, %arg2: memref<1x4x16xf32, #tpu.memory_space<vmem>>, %arg3: memref<1x1x4x2xbf16, #tpu.memory_space<vmem>>, %arg4: memref<4x1xf32, #tpu.memory_space<vmem>>, %arg5: memref<4x1xf32, #tpu.memory_space<vmem>>, %arg6: memref<3x8x4xbf16, #tpu.memory_space<vmem>>, %arg7: memref<1x12x16xf32, #tpu.memory_space<vmem>>) attributes {dimension_semantics = [#tpu.dimension_semantics<parallel>, #tpu.dimension_semantics<parallel>], iteration_bounds = array<i64: 2, 1>, scalar_prefetch = 0 : i64, scratch_operands = 0 : i64, tpu.core_type = #tpu.core_type<tc>, window_params = [{transform_indices = @transform_0, window_bounds = array<i64: 1, 4, 16>}, {transform_indices = @transform_1, window_bounds = array<i64: 1, 1, 4, 2>}, {pipeline_mode = #tpu.pipeline_mode<synchronous>, transform_indices = @transform_2, window_bounds = array<i64: 4, 1>}, {pipeline_mode = #tpu.pipeline_mode<synchronous>, transform_indices = @transform_3, window_bounds = array<i64: 4, 1>}, {pipeline_mode = #tpu.pipeline_mode<synchronous>, transform_indices = @transform_4, window_bounds = array<i64: 3, 8, 4>}, {transform_indices = @transform_5, window_bounds = array<i64: 1, 12, 16>}]} {
    %c0 = arith.constant 0 : index
    %c0_0 = arith.constant 0 : index
    %c0_1 = arith.constant 0 : index
    %0 = vector.load %arg2[%c0, %c0_0, %c0_1] : memref<1x4x16xf32, #tpu.memory_space<vmem>>, vector<1x4x16xf32>
    %c0_2 = arith.constant 0 : index
    %c0_3 = arith.constant 0 : index
    %c0_4 = arith.constant 0 : index
    %1 = vector.load %arg7[%c0_2, %c0_3, %c0_4] : memref<1x12x16xf32, #tpu.memory_space<vmem>>, vector<1x4x16xf32>
    tpu.vector_store %arg7[%c0_2, %c0_3, %c0_4], %0 {strides = array<i32>} : memref<1x12x16xf32, #tpu.memory_space<vmem>>, vector<1x4x16xf32>,
    %c0_5 = arith.constant 0 : index
    %c0_6 = arith.constant 0 : index
    %2 = vector.load %arg4[%c0_5, %c0_6] : memref<4x1xf32, #tpu.memory_space<vmem>>, vector<4x1xf32>
    %c0_7 = arith.constant 0 : index
    %c0_8 = arith.constant 0 : index
    %3 = vector.load %arg5[%c0_7, %c0_8] : memref<4x1xf32, #tpu.memory_space<vmem>>, vector<4x1xf32>
    %c0_9 = arith.constant 0 : index
    %c0_10 = arith.constant 0 : index
    %c0_11 = arith.constant 0 : index
    %4 = vector.load %arg6[%c0_9, %c0_10, %c0_11] : memref<3x8x4xbf16, #tpu.memory_space<vmem>>, vector<1x8x4xbf16>
    %5 = vector.shape_cast %4 : vector<1x8x4xbf16> to vector<8x4xbf16>
    %c1 = arith.constant 1 : index
    %c0_12 = arith.constant 0 : index
    %c0_13 = arith.constant 0 : index
    %6 = vector.load %arg6[%c1, %c0_12, %c0_13] : memref<3x8x4xbf16, #tpu.memory_space<vmem>>, vector<1x8x4xbf16>
    %7 = vector.shape_cast %6 : vector<1x8x4xbf16> to vector<8x4xbf16>
    %c2 = arith.constant 2 : index
    %c0_14 = arith.constant 0 : index
    %c0_15 = arith.constant 0 : index
    %8 = vector.load %arg6[%c2, %c0_14, %c0_15] : memref<3x8x4xbf16, #tpu.memory_space<vmem>>, vector<1x8x4xbf16>
    %9 = vector.shape_cast %8 : vector<1x8x4xbf16> to vector<8x4xbf16>
    %c0_i32 = arith.constant 0 : i32
    %10 = arith.index_cast %c0_i32 : i32 to index
    %c0_16 = arith.constant 0 : index
    %c0_17 = arith.constant 0 : index
    %11 = vector.load %arg2[%10, %c0_16, %c0_17] : memref<1x4x16xf32, #tpu.memory_space<vmem>>, vector<1x4x16xf32>
    %12 = vector.shape_cast %11 : vector<1x4x16xf32> to vector<4x16xf32>
    %13 = vector.broadcast %2 : vector<4x1xf32> to vector<4x16xf32>
    %14 = arith.mulf %12, %13 : vector<4x16xf32>
    %15 = vector.broadcast %3 : vector<4x1xf32> to vector<4x16xf32>
    %16 = arith.addf %14, %15 : vector<4x16xf32>
    %cst = arith.constant 0.000000e+00 : f32
    %17 = vector.broadcast %cst : f32 to vector<4x16xf32>
    %18 = arith.maximumf %16, %17 : vector<4x16xf32>
    %19 = arith.index_cast %c0_i32 : i32 to index
    %c0_18 = arith.constant 0 : index
    %c0_19 = arith.constant 0 : index
    %c0_20 = arith.constant 0 : index
    %20 = vector.load %arg3[%19, %c0_18, %c0_19, %c0_20] : memref<1x1x4x2xbf16, #tpu.memory_space<vmem>>, vector<1x1x4x2xbf16>
    %21 = vector.shape_cast %20 : vector<1x1x4x2xbf16> to vector<1x4x2xbf16>
    %22 = vector.shape_cast %21 : vector<1x4x2xbf16> to vector<4x2xbf16>
    %23 = arith.truncf %18 : vector<4x16xf32> to vector<4x16xbf16>
    %24 = vector.extract_strided_slice %22 {offsets = [0, 0], sizes = [4, 1], strides = [1, 1]} : vector<4x2xbf16> to vector<4x1xbf16>
    %25 = vector.extract_strided_slice %22 {offsets = [0, 1], sizes = [4, 1], strides = [1, 1]} : vector<4x2xbf16> to vector<4x1xbf16>
    %26 = tpu.concatenate %24, %23, %25 in 1 : vector<4x1xbf16>, vector<4x16xbf16>, vector<4x1xbf16> -> vector<4x18xbf16>
    %27 = vector.extract_strided_slice %26 {offsets = [0, 0], sizes = [4, 16], strides = [1, 1]} : vector<4x18xbf16> to vector<4x16xbf16>
    %cst_21 = arith.constant dense<0.000000e+00> : vector<8x16xf32>
    %28 = tpu.matmul %5, %27, %cst_21 {dimension_numbers = #tpu.dot_dimension_numbers<[1], [0], [0], [1], [0, 0, 1, 1], [], []>} : vector<8x4xbf16>, vector<4x16xbf16>, vector<8x16xf32> -> vector<8x16xf32>
    %29 = vector.extract_strided_slice %26 {offsets = [0, 1], sizes = [4, 16], strides = [1, 1]} : vector<4x18xbf16> to vector<4x16xbf16>
    %cst_22 = arith.constant dense<0.000000e+00> : vector<8x16xf32>
    %30 = tpu.matmul %7, %29, %cst_22 {dimension_numbers = #tpu.dot_dimension_numbers<[1], [0], [0], [1], [0, 0, 1, 1], [], []>} : vector<8x4xbf16>, vector<4x16xbf16>, vector<8x16xf32> -> vector<8x16xf32>
    %31 = arith.addf %28, %30 : vector<8x16xf32>
    %32 = vector.extract_strided_slice %26 {offsets = [0, 2], sizes = [4, 16], strides = [1, 1]} : vector<4x18xbf16> to vector<4x16xbf16>
    %cst_23 = arith.constant dense<0.000000e+00> : vector<8x16xf32>
    %33 = tpu.matmul %9, %32, %cst_23 {dimension_numbers = #tpu.dot_dimension_numbers<[1], [0], [0], [1], [0, 0, 1, 1], [], []>} : vector<8x4xbf16>, vector<4x16xbf16>, vector<8x16xf32> -> vector<8x16xf32>
    %34 = arith.addf %31, %33 : vector<8x16xf32>
    %35 = vector.shape_cast %34 : vector<8x16xf32> to vector<1x8x16xf32>
    %36 = arith.index_cast %c0_i32 : i32 to index
    %c4 = arith.constant 4 : index
    %c0_24 = arith.constant 0 : index
    %37 = vector.load %arg7[%36, %c4, %c0_24] : memref<1x12x16xf32, #tpu.memory_space<vmem>>, vector<1x8x16xf32>
    tpu.vector_store %arg7[%36, %c4, %c0_24], %35 {strides = array<i32>} : memref<1x12x16xf32, #tpu.memory_space<vmem>>, vector<1x8x16xf32>,
    %c1_i32 = arith.constant 1 : i32
    return
  }
  func.func @transform_0(%arg0: i32, %arg1: i32) -> (i32, i32, i32) {
    %c0_i32 = arith.constant 0 : i32
    %c0_i32_0 = arith.constant 0 : i32
    return %arg0, %c0_i32, %arg1 : i32, i32, i32
  }
  func.func @transform_1(%arg0: i32, %arg1: i32) -> (i32, i32, i32, i32) {
    %c0_i32 = arith.constant 0 : i32
    %c0_i32_0 = arith.constant 0 : i32
    %c0_i32_1 = arith.constant 0 : i32
    return %arg0, %arg1, %c0_i32, %c0_i32_0 : i32, i32, i32, i32
  }
  func.func @transform_2(%arg0: i32, %arg1: i32) -> (i32, i32) {
    %c0_i32 = arith.constant 0 : i32
    %c0_i32_0 = arith.constant 0 : i32
    %c0_i32_1 = arith.constant 0 : i32
    return %c0_i32, %c0_i32_0 : i32, i32
  }
  func.func @transform_3(%arg0: i32, %arg1: i32) -> (i32, i32) {
    %c0_i32 = arith.constant 0 : i32
    %c0_i32_0 = arith.constant 0 : i32
    %c0_i32_1 = arith.constant 0 : i32
    return %c0_i32, %c0_i32_0 : i32, i32
  }
  func.func @transform_4(%arg0: i32, %arg1: i32) -> (i32, i32, i32) {
    %c0_i32 = arith.constant 0 : i32
    %c0_i32_0 = arith.constant 0 : i32
    %c0_i32_1 = arith.constant 0 : i32
    %c0_i32_2 = arith.constant 0 : i32
    return %c0_i32, %c0_i32_0, %c0_i32_1 : i32, i32, i32
  }
  func.func @transform_5(%arg0: i32, %arg1: i32) -> (i32, i32, i32) {
    %c0_i32 = arith.constant 0 : i32
    %c0_i32_0 = arith.constant 0 : i32
    return %arg0, %c0_i32, %arg1 : i32, i32, i32
  }
}

</mosaic_0001>

<bundles_post_ra>
// kernel: tpu_custom_call.1
= control target key start
LH: loop header
LB: loop body
LE: loop exit
PB: predicated region body
PF: predicated region fallthrough
CT: control target
= control target key end

     0   :  { %s706_s18 = smov 0   ;;  %s708_s19 = smov 0   ;;  %s767_s0 = inlined_call_operand.vmem [shape: f32[2,4,16], index: 0, kind: input, shape index: {}]   ;;  %s768_s1 = inlined_call_operand.vmem [shape: bf16[2,1,4,2], index: 1, kind: input, shape index: {}]   ;;  %s769_s2 = inlined_call_operand.vmem [shape: f32[4,1], index: 2, kind: input, shape index: {}]   ;;  %s770_s3 = inlined_call_operand.vmem [shape: f32[4,1], index: 3, kind: input, shape index: {}]   ;;  %s771_s4 = inlined_call_operand.vmem [shape: bf16[3,8,4], index: 4, kind: input, shape index: {}]   ;;  %s772_s5 = inlined_call_operand.vmem [shape: f32[2,12,16], index: 5, kind: output, shape index: {}]  }
   0x1   :  { %s710_s20 = smov 0  }
   0x2 LB: > { %s27_s21 = sadd.s32 1, %s662_s19  ;;  %p574_p0 = scmp.ge.s32.totalorder %s666_s20, 1  ;;  %s666_s20 = sphi %s710_s20, %s15_s20   ;;  %s662_s19 = sphi %s708_s19, %s774_s19   ;;  %s658_s18 = sphi %s706_s18, %s773_s18  }
   0x3   : > { %p29_p1 = scmp.ge.s32.totalorder %s27_s21, 2  ;;  %p219_p2 = scmp.lt.s32.totalorder %s666_s20, 3 }
   0x5   : > { %s776_s21 = smov (%p29_p1, %s27_s21), 0  ;;  %p220_p3 = pnand %p574_p0, %p219_p2 }
   0x6   : > { %p259_p4 = scmp.lt.s32.totalorder (!%p220_p3), %s658_s18, 1  ;;  %s671_s13 = smov (!%p220_p3), 1  }
   0x7   : > { %223 = sbr.rel (%p220_p3) target bundleno = 594 (0x252), region = 40  ;;  %s672_s14 = smov (!%p220_p3), 16  }
   0x8   : > { %s674_s15 = smov (!%p220_p3), 126   ;;  %s675_s16 = smov (!%p220_p3), 127  }
   0xc   : > { %v285_v0 = vld [vmem:[%s769_s2] sm:$0xf]  ;;  %v668_v1 = vmov 0   ;;  %s778_s18 = smov (!%p259_p4, %s658_s18), 1  ;;  %vm283_vm0 = vcmask 125952   ;;  %v315_v6 = vlaneseq  ;;  %v670_v9 = vmov 0.0  }
   0xd   : > { %643 = vset.pattern.permute.xlu0 %v668_v1  ;;  %v286_v2 = vld [vmem:[%s770_s3] sm:$0xf]  ;;  %s575_s26 = sshll.u32 %s778_s18, 2  ;;  %s586_s27 = sshll.u32 %s778_s18, 4  ;;  %v669_v4 = vmov 1983009808   ;;  %599 = vmatprep.subr.bf16.mxu1 %v670_v9 }
   0xe   : > { %295 = vperm.xlu0 %643, %v285_v0   ;;  %s265_s30 = scalar_lea.vmem %s767_s0, %s575_s26  ;;  %s736_s8 = scalar_lea.vmem %s772_s5, %s586_s27  ;;  %v313_v5 = vunpack.c.l.s4 %v669_v4  ;;  %593 = vmatprep.subr.bf16.mxu0 %v670_v9  ;;  %v316_v12 = vshrl.u32 %v315_v6, 7  ;;  %vm673_vm1 = vmmov 0   ;;  %vm321_vm2 = vcmask 7168   ;;  %v287_v25 = vld [vmem:[%s771_s4] sm:$0xf] }
   0xf   : > { %v282_v3 = vld [vmem:[%s265_s30] sm:$0xf]  ;;  %s576_s9 = sshll.u32 %s778_s18, 1  ;;  %595 = vmatprep.mubr.msk.bf16.mxu0 %vm673_vm1, %v670_v9  ;;  %601 = vmatprep.mubr.msk.bf16.mxu1 %vm673_vm1, %v670_v9  ;;  %vm325_vm3 = vcmask 138240   ;;  %vm335_vm4 = vcmask 1041408   ;;  %vm331_vm5 = vcmask 31744  }
  0x10   : > { %284 = vst.msk [vmem:[%s736_s8] sm:$0xf] %vm283_vm0, %v282_v3  ;;  %v292_v8 = vld [vmem:[%s265_s30] sm:$0xf]  ;;  %v314_v11 = vunpack.c.0.s8 %v313_v5  ;;  %s272_s12 = scalar_lea.vmem %s768_s1, %s576_s9  ;;  %v579_v29 = vld [vmem:[%s771_s4 + $0x4] sm:$0xf] }
  0x11   : > { %v306_v17 = vld [vmem:[%s272_s12] sm:$0x3]  ;;  %v580_v31 = vld [vmem:[%s771_s4 + $0x8] sm:$0xf]  ;;  %vm473_vm6 = vcmask 130048  }
  0x12   : > { %301 = vperm.xlu0 %643, %v286_v2   ;;  %v317_v16 = vsub.s32 %v314_v11, %v316_v12 }
  0x14   : > { %v318_v19 = vrot.slane %v306_v17, %v317_v16 }
  0x89   : > { %v296_v7 = vpop.permute.xlu0 %295 }
  0x8a   : > { %v298_v10 = vmul.f32 %v296_v7, %v292_v8 }
  0x8d   : > { %v302_v13 = vpop.permute.xlu0 %301 }
  0x8e   : > { %v304_v14 = vadd.f32 %v302_v13, %v298_v10 }
  0x90   : > { %v305_v15 = vmax.f32 %v304_v14, 0.0 }
  0x92   : > { %v307_v18 = vpack.c.bf16 %v305_v15, %v305_v15 }
  0x94   : > { %309 = vrot.lane.b32.xlu1 %v307_v18, %s671_s13 }
  0x98   : > { %319 = vrot.lane.b32.xlu1 %v318_v19, %s672_s14 }
 0x106   : > { %v310_v20 = vpop.permute.xlu1 %309 }
 0x107   : > { %v324_v21 = vsel %vm321_vm2, %v306_v17, %v310_v20 }
 0x10a   : > { %v320_v22 = vpop.permute.xlu1 %319 }
 0x10b   : > { %v327_v23 = vsel %vm325_vm3, %v324_v21, %v320_v22 }
 0x10c   : > { %424 = vrot.lane.b32.xlu1 %v327_v23, %s674_s15  ;;  %329 = vrot.lane.b32.xlu0 %v327_v23, %s675_s16  ;;  %v382_v24 = vsel %vm335_vm4, %v327_v23, 0 }
 0x10d   : > { %600 = vmatpush3.bf16.msra.mxu1 %v382_v24 }
 0x110   : > { %602 = vmatmul.mubr.msk.bf16.vlgmr.msra.gmra.mxu1 %vm331_vm5, %v287_v25 }
 0x17e   : > { %v330_v26 = vpop.permute.xlu0 %329  ;;  %v425_v28 = vpop.permute.xlu1 %424 }
 0x17f   : > { %v337_v27 = vsel %vm335_vm4, %v330_v26, 0  ;;  %v430_v30 = vsel %vm335_vm4, %v425_v28, 0 }
 0x180   : > { %594 = vmatpush3.bf16.msra.mxu0 %v337_v27 }
 0x181   : > { %605 = vmatprep.subr.bf16.mxu0 %v670_v9 }
 0x183   : > { %596 = vmatmul.mubr.msk.bf16.vlgmr.msra.gmra.mxu0 %vm331_vm5, %v579_v29 }
 0x184   : > { %606 = vmatpush3.bf16.msra.mxu0 %v430_v30  ;;  %607 = vmatprep.mubr.msk.bf16.mxu0 %vm673_vm1, %v670_v9 }
 0x18b   : > { %608 = vmatmul.mubr.msk.bf16.vlgmr.msra.gmra.mxu0 %vm331_vm5, %v580_v31 }
 0x1d0   : > { %v418_v32 = vpop.f32.mrf.mxu1 }
 0x1d2   : > { %v603_v33 = vpop.f32.mrf.mxu1 }
 0x1d4   : > { %v421_v34 = vpop.f32.mrf.mxu1 }
 0x1d6   : > { %v604_v35 = vpop.f32.mrf.mxu1 }
 0x243   : > { %v373_v36 = vpop.f32.mrf.mxu0 }
 0x244   : > { %v419_v40 = vadd.f32 %v418_v32, %v373_v36 }
 0x245   : > { %v597_v37 = vpop.f32.mrf.mxu0 }
 0x247   : > { %v376_v38 = vpop.f32.mrf.mxu0 }
 0x249   : > { %v598_v39 = vpop.f32.mrf.mxu0 }
 0x24b   : > { %v466_v41 = vpop.f32.mrf.mxu0 }
 0x24c   : > { %v472_v42 = vadd.f32 %v466_v41, %v419_v40 }
 0x24d   : > { %v609_v43 = vpop.f32.mrf.mxu0 }
 0x24e   : > { %474 = vst.msk [vmem:[%s736_s8 + $0x4] sm:$0xff] %vm473_vm6, %v472_v42 }
 0x24f   : > { %v469_v44 = vpop.f32.mrf.mxu0 }
 0x251   : > { %v610_v45 = vpop.f32.mrf.mxu0 }
 0x252 PF: > { %s15_s20 = sadd.s32 1, %s666_s20   ;;  %s773_s18 = smov %s662_s19 }
 0x253   : > { %p12_p5 = scmp.ge.s32.totalorder %s15_s20, 4   ;;  %s774_s19 = smov %s776_s21 }
 0x255   :  { %14 = sbr.rel (!%p12_p5) target bundleno = 2 (0x2), region = 75 }

</bundles_post_ra>
